<compile_context>
chip_gen: v7x
topology: tpu7x:2x2x1
jax: 0.10.0
libtpu: 0.0.40
codegen_flags: <defaults>
</compile_context>

<pallas_src>
import functools

import jax
import jax.numpy as jnp
from jax.experimental import pallas as pl
from jax.experimental.pallas import tpu as pltpu


def _round_up(x, m):
    return ((x + m - 1) // m) * m


# ----------------------------------------------------------------------------
# Pallas kernel: the full fused MLP forward (one batch tile per grid step).
# ----------------------------------------------------------------------------
def _mlp_kernel(
    ms_ref, ps_ref,                 # streamed batch tiles (f32)
    w153_ref, b153_ref,             # fused fc_enc_1 | fc_pol_53   (dim_input1, 3h)
    w2_ref, b2_ref,                 # fc_enc_2                     (2h, h)
    w352_ref, b352_ref,             # fused fc_enc_3 | fc_pol_52   (dim_input2, 2h)
    w4_ref, b4_ref,                 # fc_enc_4                     (2h, emb)
    w51_ref, b51_ref,               # fc_pol_51                    (emb, h)
    w6_ref, b6_ref,                 # fc_pol_6                     (3h, h)
    w7_ref, b7_ref,                 # fc_pol_7                     (h, out)
    out_ref,
    *, hidden,
):
    h = hidden
    bf16 = jnp.bfloat16

    def dot(x, w):
        # bf16 MXU operands, f32 accumulation.
        return jnp.dot(x.astype(bf16), w, preferred_element_type=jnp.float32)

    def relu(x):
        return jnp.maximum(x, 0.0)

    ms = ms_ref[...]                                  # (TB, dim_input1)
    ps = ps_ref[...]                                  # (TB, dim_input2)

    # ---- fused fc_enc_1 | fc_pol_53 (both consume market_states) ----
    r1 = dot(ms, w153_ref[...]) + b153_ref[...]       # (TB, 3h)
    x1 = relu(r1[:, : 2 * h])                         # fc_enc_1 output
    pz = relu(r1[:, 2 * h:])                          # fc_pol_53 output (gather folded)

    x = relu(dot(x1, w2_ref[...]) + b2_ref[...])      # (TB, h)

    # ---- fused fc_enc_3 | fc_pol_52 (both consume private_states) ----
    r3 = dot(ps, w352_ref[...]) + b352_ref[...]       # (TB, 2h)
    y = relu(r3[:, :h])                               # fc_enc_3 output
    py = relu(r3[:, h:])                              # fc_pol_52 output

    # ---- fc_enc_4 on concat(x, y): partial dots over static weight slices ----
    emb = dot(x, w4_ref[:h, :]) + dot(y, w4_ref[h:, :]) + b4_ref[...]
    # `detach` only blocks gradients; forward values are identical.

    # ---- policy head ----
    px = relu(dot(emb, w51_ref[...]) + b51_ref[...])  # (TB, h)

    # fc_pol_6 on concat(px, py, pz): partial dots over static weight slices.
    h6 = relu(dot(px, w6_ref[:h, :])
              + dot(py, w6_ref[h:2 * h, :])
              + dot(pz, w6_ref[2 * h:, :])
              + b6_ref[...])                          # (TB, h)

    out_ref[...] = dot(h6, w7_ref[...]) + b7_ref[...]  # (TB, dim_output) f32


# ----------------------------------------------------------------------------
# One-time parameter repack: fuse shared-input layers, cast weights to bf16.
# ----------------------------------------------------------------------------
def pack_params(params):
    bf16 = jnp.bfloat16
    return dict(
        w153=jnp.concatenate([params["w1"], params["w53"]], axis=1).astype(bf16),
        b153=jnp.concatenate([params["b1"], params["b53"]], axis=1).astype(jnp.float32),
        w2=params["w2"].astype(bf16), b2=params["b2"],
        w352=jnp.concatenate([params["w3"], params["w52"]], axis=1).astype(bf16),
        b352=jnp.concatenate([params["b3"], params["b52"]], axis=1).astype(jnp.float32),
        w4=params["w4"].astype(bf16), b4=params["b4"],
        w51=params["w51"].astype(bf16), b51=params["b51"],
        w6=params["w6"].astype(bf16), b6=params["b6"],
        w7=params["w7"].astype(bf16), b7=params["b7"],
    )


# ----------------------------------------------------------------------------
# Wrapper: tiling decisions + pallas_call.
# ----------------------------------------------------------------------------
def mlp_forward(market_states, private_states, packed, *, tile_b=None):
    """market_states: (B, dim_input1) f32, private_states: (B, dim_input2) f32."""
    B, dim_input1 = market_states.shape
    dim_input2 = private_states.shape[1]
    hidden = packed["w2"].shape[1]
    dim_output = packed["w7"].shape[1]

    if tile_b is None:
        # Large tiles amortize the ~0.35us/step grid overhead and fill the MXU;
        # keep >= 2 grid steps so both v7x TensorCores get work.
        tile_b = min(1024, _round_up(pl.cdiv(B, 2), 8))
    tile_b = max(8, _round_up(tile_b, 8))
    grid = (pl.cdiv(B, tile_b),)   # ragged last block: reads padded, writes masked

    weight_order = [
        "w153", "b153", "w2", "b2", "w352", "b352", "w4", "b4",
        "w51", "b51", "w6", "b6", "w7", "b7",
    ]
    weights = [packed[k] for k in weight_order]

    # Streamed inputs: batch-tiled.  Weights/biases: untiled, VMEM-resident.
    vmem_full = pl.BlockSpec(memory_space=pltpu.MemorySpace.VMEM)
    in_specs = [
        pl.BlockSpec((tile_b, dim_input1), lambda i: (i, 0)),   # market_states
        pl.BlockSpec((tile_b, dim_input2), lambda i: (i, 0)),   # private_states
    ] + [vmem_full] * len(weights)

    kernel = functools.partial(_mlp_kernel, hidden=hidden)

    out = pl.pallas_call(
        kernel,
        out_shape=jax.ShapeDtypeStruct((B, dim_output), jnp.float32),
        grid=grid,
        in_specs=in_specs,
        out_specs=pl.BlockSpec((tile_b, dim_output), lambda i: (i, 0)),
        compiler_params=pltpu.CompilerParams(
            dimension_semantics=("parallel",),
        ),
    )(market_states, private_states, *weights)
    return out


# ----------------------------------------------------------------------------
# Deterministic parameter init (PyTorch nn.Linear-style uniform bounds).
# ----------------------------------------------------------------------------
def init_params(key, dim_input1, dim_input2, dim_embedding, dim_output,
                market_state3_indices, hidden):
    dim_input3 = len(market_state3_indices)

    layer_dims = {
        "1": (dim_input1, 2 * hidden),
        "2": (2 * hidden, hidden),
        "3": (dim_input2, hidden),
        "4": (2 * hidden, dim_embedding),
        "51": (dim_embedding, hidden),
        "52": (dim_input2, hidden),
        "53": (dim_input3, hidden),
        "6": (3 * hidden, hidden),
        "7": (hidden, dim_output),
    }

    params = {}
    keys = jax.random.split(key, 2 * len(layer_dims))
    for i, (name, (fan_in, fan_out)) in enumerate(layer_dims.items()):
        bound = 1.0 / (fan_in ** 0.5)
        # Stored already transposed: (in_features, out_features).
        w = jax.random.uniform(keys[2 * i], (fan_in, fan_out),
                               minval=-bound, maxval=bound, dtype=jnp.float32)
        b = jax.random.uniform(keys[2 * i + 1], (1, fan_out),
                               minval=-bound, maxval=bound, dtype=jnp.float32)
        params["w" + name] = w
        params["b" + name] = b

    # Fold the column gather market_states[:, indices] into fc_pol_53 by
    # scatter-ADDING its rows into a (dim_input1, hidden) matrix.  `add` (not
    # `set`) keeps gather+matmul semantics when indices contain duplicates.
    w53_small = params["w53"]                          # (dim_input3, hidden)
    idx = jnp.asarray(market_state3_indices)
    w53_full = jnp.zeros((dim_input1, hidden), jnp.float32).at[idx].add(w53_small)
    params["w53_small"] = w53_small                    # kept for the reference check
    params["w53"] = w53_full
    return params


# ----------------------------------------------------------------------------
# Pure-JAX references.
# ----------------------------------------------------------------------------
def reference_forward_f32(ms, ps, params, market_state3_indices):
    """Exact mirror of the PyTorch forward in f32."""
    relu = lambda v: jnp.maximum(v, 0.0)
    lin = lambda v, w, b: v @ w + b
    x = relu(lin(ms, params["w1"], params["b1"]))
    x = relu(lin(x, params["w2"], params["b2"]))
    y = relu(lin(ps, params["w3"], params["b3"]))
    emb = lin(jnp.concatenate([x, y], axis=1), params["w4"], params["b4"])
    px = relu(lin(emb, params["w51"], params["b51"]))
    py = relu(lin(ps, params["w52"], params["b52"]))
    ms3 = ms[:, jnp.asarray(market_state3_indices)]
    pz = relu(lin(ms3, params["w53_small"], params["b53"]))
    cat = jnp.concatenate([px, py, pz], axis=1)
    h = relu(lin(cat, params["w6"], params["b6"]))
    return lin(h, params["w7"], params["b7"])


def reference_forward_bf16(ms, ps, params, market_state3_indices):
    """Precision-matched reference: bf16 matmul operands, f32 accumulation."""
    bf16 = jnp.bfloat16
    relu = lambda v: jnp.maximum(v, 0.0)

    def lin(v, w, b):
        return jnp.dot(v.astype(bf16), w.astype(bf16),
                       preferred_element_type=jnp.float32) + b

    x = relu(lin(ms, params["w1"], params["b1"]))
    x = relu(lin(x, params["w2"], params["b2"]))
    y = relu(lin(ps, params["w3"], params["b3"]))
    emb = lin(jnp.concatenate([x, y], axis=1), params["w4"], params["b4"])
    px = relu(lin(emb, params["w51"], params["b51"]))
    py = relu(lin(ps, params["w52"], params["b52"]))
    ms3 = ms[:, jnp.asarray(market_state3_indices)]
    pz = relu(lin(ms3, params["w53_small"], params["b53"]))
    cat = jnp.concatenate([px, py, pz], axis=1)
    h = relu(lin(cat, params["w6"], params["b6"]))
    return lin(h, params["w7"], params["b7"])


if __name__ == "__main__":
    # Small shapes consistent with the module's forward.
    B = 256
    dim_input1 = 24        # market state features
    dim_input2 = 2         # private state features
    dim_embedding = 16
    dim_output = 3
    hidden = 32
    market_state3_indices = [0, 2, 5, 7, 11, 2]   # duplicate index on purpose

    key = jax.random.PRNGKey(0)
    k_ms, k_ps, k_params = jax.random.split(key, 3)

    market_states = jax.random.normal(k_ms, (B, dim_input1), dtype=jnp.float32)
    private_states = jax.random.normal(k_ps, (B, dim_input2), dtype=jnp.float32)

    params = init_params(k_params, dim_input1, dim_input2, dim_embedding,
                         dim_output, market_state3_indices, hidden)
    packed = pack_params(params)

    out = mlp_forward(market_states, private_states, packed)
    out = jax.block_until_ready(out)

    ref_bf16 = reference_forward_bf16(market_states, private_states, params,
                                      market_state3_indices)
    ref_f32 = reference_forward_f32(market_states, private_states, params,
                                    market_state3_indices)

    assert out.shape == (B, dim_output)
    # Tight check against the precision-matched (bf16-operand) reference.
    assert jnp.allclose(out, ref_bf16, atol=1e-3, rtol=1e-3)
    # Loose check against the exact f32 PyTorch-equivalent forward.
    assert jnp.allclose(out, ref_f32, atol=5e-2, rtol=5e-2)

    print("KERNEL_OK")
</pallas_src>

<mosaic_0001>
module attributes {stable_mosaic.version = 11 : i64} {
  func.func @_mlp_kernel(%arg0: i32, %arg1: memref<128x24xf32, #tpu.memory_space<vmem>>, %arg2: memref<128x2xf32, #tpu.memory_space<vmem>>, %arg3: memref<24x96xbf16, #tpu.memory_space<vmem>>, %arg4: memref<1x96xf32, #tpu.memory_space<vmem>>, %arg5: memref<64x32xbf16, #tpu.memory_space<vmem>>, %arg6: memref<1x32xf32, #tpu.memory_space<vmem>>, %arg7: memref<2x64xbf16, #tpu.memory_space<vmem>>, %arg8: memref<1x64xf32, #tpu.memory_space<vmem>>, %arg9: memref<64x16xbf16, #tpu.memory_space<vmem>>, %arg10: memref<1x16xf32, #tpu.memory_space<vmem>>, %arg11: memref<16x32xbf16, #tpu.memory_space<vmem>>, %arg12: memref<1x32xf32, #tpu.memory_space<vmem>>, %arg13: memref<96x32xbf16, #tpu.memory_space<vmem>>, %arg14: memref<1x32xf32, #tpu.memory_space<vmem>>, %arg15: memref<32x3xbf16, #tpu.memory_space<vmem>>, %arg16: memref<1x3xf32, #tpu.memory_space<vmem>>, %arg17: memref<128x3xf32, #tpu.memory_space<vmem>>) attributes {dimension_semantics = [#tpu.dimension_semantics<parallel>], iteration_bounds = array<i64: 2>, scalar_prefetch = 0 : i64, scratch_operands = 0 : i64, tpu.core_type = #tpu.core_type<tc>, window_params = [{transform_indices = @transform_0, window_bounds = array<i64: 128, 24>}, {transform_indices = @transform_1, window_bounds = array<i64: 128, 2>}, {pipeline_mode = #tpu.pipeline_mode<synchronous>, transform_indices = @transform_2, window_bounds = array<i64: 24, 96>}, {pipeline_mode = #tpu.pipeline_mode<synchronous>, transform_indices = @transform_3, window_bounds = array<i64: 1, 96>}, {pipeline_mode = #tpu.pipeline_mode<synchronous>, transform_indices = @transform_4, window_bounds = array<i64: 64, 32>}, {pipeline_mode = #tpu.pipeline_mode<synchronous>, transform_indices = @transform_5, window_bounds = array<i64: 1, 32>}, {pipeline_mode = #tpu.pipeline_mode<synchronous>, transform_indices = @transform_6, window_bounds = array<i64: 2, 64>}, {pipeline_mode = #tpu.pipeline_mode<synchronous>, transform_indices = @transform_7, window_bounds = array<i64: 1, 64>}, {pipeline_mode = #tpu.pipeline_mode<synchronous>, transform_indices = @transform_8, window_bounds = array<i64: 64, 16>}, {pipeline_mode = #tpu.pipeline_mode<synchronous>, transform_indices = @transform_9, window_bounds = array<i64: 1, 16>}, {pipeline_mode = #tpu.pipeline_mode<synchronous>, transform_indices = @transform_10, window_bounds = array<i64: 16, 32>}, {pipeline_mode = #tpu.pipeline_mode<synchronous>, transform_indices = @transform_11, window_bounds = array<i64: 1, 32>}, {pipeline_mode = #tpu.pipeline_mode<synchronous>, transform_indices = @transform_12, window_bounds = array<i64: 96, 32>}, {pipeline_mode = #tpu.pipeline_mode<synchronous>, transform_indices = @transform_13, window_bounds = array<i64: 1, 32>}, {pipeline_mode = #tpu.pipeline_mode<synchronous>, transform_indices = @transform_14, window_bounds = array<i64: 32, 3>}, {pipeline_mode = #tpu.pipeline_mode<synchronous>, transform_indices = @transform_15, window_bounds = array<i64: 1, 3>}, {transform_indices = @transform_16, window_bounds = array<i64: 128, 3>}]} {
    %c0 = arith.constant 0 : index
    %c0_0 = arith.constant 0 : index
    %0 = vector.load %arg1[%c0, %c0_0] : memref<128x24xf32, #tpu.memory_space<vmem>>, vector<128x24xf32>
    %c0_1 = arith.constant 0 : index
    %c0_2 = arith.constant 0 : index
    %1 = vector.load %arg2[%c0_1, %c0_2] : memref<128x2xf32, #tpu.memory_space<vmem>>, vector<128x2xf32>
    %c0_3 = arith.constant 0 : index
    %c0_4 = arith.constant 0 : index
    %2 = vector.load %arg3[%c0_3, %c0_4] : memref<24x96xbf16, #tpu.memory_space<vmem>>, vector<24x96xbf16>
    %3 = arith.truncf %0 : vector<128x24xf32> to vector<128x24xbf16>
    %cst = arith.constant dense<0.000000e+00> : vector<128x96xf32>
    %4 = tpu.matmul %3, %2, %cst {dimension_numbers = #tpu.dot_dimension_numbers<[1], [0], [0], [1], [0, 0, 1, 1], [], []>} : vector<128x24xbf16>, vector<24x96xbf16>, vector<128x96xf32> -> vector<128x96xf32>
    %c0_5 = arith.constant 0 : index
    %c0_6 = arith.constant 0 : index
    %5 = vector.load %arg4[%c0_5, %c0_6] : memref<1x96xf32, #tpu.memory_space<vmem>>, vector<1x96xf32>
    %6 = vector.broadcast %5 : vector<1x96xf32> to vector<128x96xf32>
    %7 = arith.addf %4, %6 : vector<128x96xf32>
    %8 = vector.extract_strided_slice %7 {offsets = [0, 0], sizes = [128, 64], strides = [1, 1]} : vector<128x96xf32> to vector<128x64xf32>
    %cst_7 = arith.constant 0.000000e+00 : f32
    %9 = vector.broadcast %cst_7 : f32 to vector<128x64xf32>
    %10 = arith.maximumf %8, %9 : vector<128x64xf32>
    %11 = vector.extract_strided_slice %7 {offsets = [0, 64], sizes = [128, 32], strides = [1, 1]} : vector<128x96xf32> to vector<128x32xf32>
    %cst_8 = arith.constant 0.000000e+00 : f32
    %12 = vector.broadcast %cst_8 : f32 to vector<128x32xf32>
    %13 = arith.maximumf %11, %12 : vector<128x32xf32>
    %c0_9 = arith.constant 0 : index
    %c0_10 = arith.constant 0 : index
    %14 = vector.load %arg5[%c0_9, %c0_10] : memref<64x32xbf16, #tpu.memory_space<vmem>>, vector<64x32xbf16>
    %15 = arith.truncf %10 : vector<128x64xf32> to vector<128x64xbf16>
    %cst_11 = arith.constant dense<0.000000e+00> : vector<128x32xf32>
    %16 = tpu.matmul %15, %14, %cst_11 {dimension_numbers = #tpu.dot_dimension_numbers<[1], [0], [0], [1], [0, 0, 1, 1], [], []>} : vector<128x64xbf16>, vector<64x32xbf16>, vector<128x32xf32> -> vector<128x32xf32>
    %c0_12 = arith.constant 0 : index
    %c0_13 = arith.constant 0 : index
    %17 = vector.load %arg6[%c0_12, %c0_13] : memref<1x32xf32, #tpu.memory_space<vmem>>, vector<1x32xf32>
    %18 = vector.broadcast %17 : vector<1x32xf32> to vector<128x32xf32>
    %19 = arith.addf %16, %18 : vector<128x32xf32>
    %cst_14 = arith.constant 0.000000e+00 : f32
    %20 = vector.broadcast %cst_14 : f32 to vector<128x32xf32>
    %21 = arith.maximumf %19, %20 : vector<128x32xf32>
    %c0_15 = arith.constant 0 : index
    %c0_16 = arith.constant 0 : index
    %22 = vector.load %arg7[%c0_15, %c0_16] : memref<2x64xbf16, #tpu.memory_space<vmem>>, vector<2x64xbf16>
    %23 = arith.truncf %1 : vector<128x2xf32> to vector<128x2xbf16>
    %cst_17 = arith.constant dense<0.000000e+00> : vector<128x64xf32>
    %24 = tpu.matmul %23, %22, %cst_17 {dimension_numbers = #tpu.dot_dimension_numbers<[1], [0], [0], [1], [0, 0, 1, 1], [], []>} : vector<128x2xbf16>, vector<2x64xbf16>, vector<128x64xf32> -> vector<128x64xf32>
    %c0_18 = arith.constant 0 : index
    %c0_19 = arith.constant 0 : index
    %25 = vector.load %arg8[%c0_18, %c0_19] : memref<1x64xf32, #tpu.memory_space<vmem>>, vector<1x64xf32>
    %26 = vector.broadcast %25 : vector<1x64xf32> to vector<128x64xf32>
    %27 = arith.addf %24, %26 : vector<128x64xf32>
    %28 = vector.extract_strided_slice %27 {offsets = [0, 0], sizes = [128, 32], strides = [1, 1]} : vector<128x64xf32> to vector<128x32xf32>
    %cst_20 = arith.constant 0.000000e+00 : f32
    %29 = vector.broadcast %cst_20 : f32 to vector<128x32xf32>
    %30 = arith.maximumf %28, %29 : vector<128x32xf32>
    %31 = vector.extract_strided_slice %27 {offsets = [0, 32], sizes = [128, 32], strides = [1, 1]} : vector<128x64xf32> to vector<128x32xf32>
    %cst_21 = arith.constant 0.000000e+00 : f32
    %32 = vector.broadcast %cst_21 : f32 to vector<128x32xf32>
    %33 = arith.maximumf %31, %32 : vector<128x32xf32>
    %c0_22 = arith.constant 0 : index
    %c0_23 = arith.constant 0 : index
    %34 = vector.load %arg9[%c0_22, %c0_23] : memref<64x16xbf16, #tpu.memory_space<vmem>>, vector<32x16xbf16>
    %35 = arith.truncf %21 : vector<128x32xf32> to vector<128x32xbf16>
    %cst_24 = arith.constant dense<0.000000e+00> : vector<128x16xf32>
    %36 = tpu.matmul %35, %34, %cst_24 {dimension_numbers = #tpu.dot_dimension_numbers<[1], [0], [0], [1], [0, 0, 1, 1], [], []>} : vector<128x32xbf16>, vector<32x16xbf16>, vector<128x16xf32> -> vector<128x16xf32>
    %c32 = arith.constant 32 : index
    %c0_25 = arith.constant 0 : index
    %37 = vector.load %arg9[%c32, %c0_25] : memref<64x16xbf16, #tpu.memory_space<vmem>>, vector<32x16xbf16>
    %38 = arith.truncf %30 : vector<128x32xf32> to vector<128x32xbf16>
    %cst_26 = arith.constant dense<0.000000e+00> : vector<128x16xf32>
    %39 = tpu.matmul %38, %37, %cst_26 {dimension_numbers = #tpu.dot_dimension_numbers<[1], [0], [0], [1], [0, 0, 1, 1], [], []>} : vector<128x32xbf16>, vector<32x16xbf16>, vector<128x16xf32> -> vector<128x16xf32>
    %40 = arith.addf %36, %39 : vector<128x16xf32>
    %c0_27 = arith.constant 0 : index
    %c0_28 = arith.constant 0 : index
    %41 = vector.load %arg10[%c0_27, %c0_28] : memref<1x16xf32, #tpu.memory_space<vmem>>, vector<1x16xf32>
    %42 = vector.broadcast %41 : vector<1x16xf32> to vector<128x16xf32>
    %43 = arith.addf %40, %42 : vector<128x16xf32>
    %c0_29 = arith.constant 0 : index
    %c0_30 = arith.constant 0 : index
    %44 = vector.load %arg11[%c0_29, %c0_30] : memref<16x32xbf16, #tpu.memory_space<vmem>>, vector<16x32xbf16>
    %45 = arith.truncf %43 : vector<128x16xf32> to vector<128x16xbf16>
    %cst_31 = arith.constant dense<0.000000e+00> : vector<128x32xf32>
    %46 = tpu.matmul %45, %44, %cst_31 {dimension_numbers = #tpu.dot_dimension_numbers<[1], [0], [0], [1], [0, 0, 1, 1], [], []>} : vector<128x16xbf16>, vector<16x32xbf16>, vector<128x32xf32> -> vector<128x32xf32>
    %c0_32 = arith.constant 0 : index
    %c0_33 = arith.constant 0 : index
    %47 = vector.load %arg12[%c0_32, %c0_33] : memref<1x32xf32, #tpu.memory_space<vmem>>, vector<1x32xf32>
    %48 = vector.broadcast %47 : vector<1x32xf32> to vector<128x32xf32>
    %49 = arith.addf %46, %48 : vector<128x32xf32>
    %cst_34 = arith.constant 0.000000e+00 : f32
    %50 = vector.broadcast %cst_34 : f32 to vector<128x32xf32>
    %51 = arith.maximumf %49, %50 : vector<128x32xf32>
    %c0_35 = arith.constant 0 : index
    %c0_36 = arith.constant 0 : index
    %52 = vector.load %arg13[%c0_35, %c0_36] : memref<96x32xbf16, #tpu.memory_space<vmem>>, vector<32x32xbf16>
    %53 = arith.truncf %51 : vector<128x32xf32> to vector<128x32xbf16>
    %cst_37 = arith.constant dense<0.000000e+00> : vector<128x32xf32>
    %54 = tpu.matmul %53, %52, %cst_37 {dimension_numbers = #tpu.dot_dimension_numbers<[1], [0], [0], [1], [0, 0, 1, 1], [], []>} : vector<128x32xbf16>, vector<32x32xbf16>, vector<128x32xf32> -> vector<128x32xf32>
    %c32_38 = arith.constant 32 : index
    %c0_39 = arith.constant 0 : index
    %55 = vector.load %arg13[%c32_38, %c0_39] : memref<96x32xbf16, #tpu.memory_space<vmem>>, vector<32x32xbf16>
    %56 = arith.truncf %33 : vector<128x32xf32> to vector<128x32xbf16>
    %cst_40 = arith.constant dense<0.000000e+00> : vector<128x32xf32>
    %57 = tpu.matmul %56, %55, %cst_40 {dimension_numbers = #tpu.dot_dimension_numbers<[1], [0], [0], [1], [0, 0, 1, 1], [], []>} : vector<128x32xbf16>, vector<32x32xbf16>, vector<128x32xf32> -> vector<128x32xf32>
    %58 = arith.addf %54, %57 : vector<128x32xf32>
    %c64 = arith.constant 64 : index
    %c0_41 = arith.constant 0 : index
    %59 = vector.load %arg13[%c64, %c0_41] : memref<96x32xbf16, #tpu.memory_space<vmem>>, vector<32x32xbf16>
    %60 = arith.truncf %13 : vector<128x32xf32> to vector<128x32xbf16>
    %cst_42 = arith.constant dense<0.000000e+00> : vector<128x32xf32>
    %61 = tpu.matmul %60, %59, %cst_42 {dimension_numbers = #tpu.dot_dimension_numbers<[1], [0], [0], [1], [0, 0, 1, 1], [], []>} : vector<128x32xbf16>, vector<32x32xbf16>, vector<128x32xf32> -> vector<128x32xf32>
    %62 = arith.addf %58, %61 : vector<128x32xf32>
    %c0_43 = arith.constant 0 : index
    %c0_44 = arith.constant 0 : index
    %63 = vector.load %arg14[%c0_43, %c0_44] : memref<1x32xf32, #tpu.memory_space<vmem>>, vector<1x32xf32>
    %64 = vector.broadcast %63 : vector<1x32xf32> to vector<128x32xf32>
    %65 = arith.addf %62, %64 : vector<128x32xf32>
    %cst_45 = arith.constant 0.000000e+00 : f32
    %66 = vector.broadcast %cst_45 : f32 to vector<128x32xf32>
    %67 = arith.maximumf %65, %66 : vector<128x32xf32>
    %c0_46 = arith.constant 0 : index
    %c0_47 = arith.constant 0 : index
    %68 = vector.load %arg15[%c0_46, %c0_47] : memref<32x3xbf16, #tpu.memory_space<vmem>>, vector<32x3xbf16>
    %69 = arith.truncf %67 : vector<128x32xf32> to vector<128x32xbf16>
    %cst_48 = arith.constant dense<0.000000e+00> : vector<128x3xf32>
    %70 = tpu.matmul %69, %68, %cst_48 {dimension_numbers = #tpu.dot_dimension_numbers<[1], [0], [0], [1], [0, 0, 1, 1], [], []>} : vector<128x32xbf16>, vector<32x3xbf16>, vector<128x3xf32> -> vector<128x3xf32>
    %c0_49 = arith.constant 0 : index
    %c0_50 = arith.constant 0 : index
    %71 = vector.load %arg16[%c0_49, %c0_50] : memref<1x3xf32, #tpu.memory_space<vmem>>, vector<1x3xf32>
    %72 = vector.broadcast %71 : vector<1x3xf32> to vector<128x3xf32>
    %73 = arith.addf %70, %72 : vector<128x3xf32>
    %c0_51 = arith.constant 0 : index
    %c0_52 = arith.constant 0 : index
    %74 = vector.load %arg17[%c0_51, %c0_52] : memref<128x3xf32, #tpu.memory_space<vmem>>, vector<128x3xf32>
    tpu.vector_store %arg17[%c0_51, %c0_52], %73 {strides = array<i32>} : memref<128x3xf32, #tpu.memory_space<vmem>>, vector<128x3xf32>,
    return
  }
  func.func @transform_0(%arg0: i32) -> (i32, i32) {
    %c0_i32 = arith.constant 0 : i32
    %c0_i32_0 = arith.constant 0 : i32
    return %arg0, %c0_i32 : i32, i32
  }
  func.func @transform_1(%arg0: i32) -> (i32, i32) {
    %c0_i32 = arith.constant 0 : i32
    %c0_i32_0 = arith.constant 0 : i32
    return %arg0, %c0_i32 : i32, i32
  }
  func.func @transform_2(%arg0: i32) -> (i32, i32) {
    %c0_i32 = arith.constant 0 : i32
    %c0_i32_0 = arith.constant 0 : i32
    %c0_i32_1 = arith.constant 0 : i32
    return %c0_i32, %c0_i32_0 : i32, i32
  }
  func.func @transform_3(%arg0: i32) -> (i32, i32) {
    %c0_i32 = arith.constant 0 : i32
    %c0_i32_0 = arith.constant 0 : i32
    %c0_i32_1 = arith.constant 0 : i32
    return %c0_i32, %c0_i32_0 : i32, i32
  }
  func.func @transform_4(%arg0: i32) -> (i32, i32) {
    %c0_i32 = arith.constant 0 : i32
    %c0_i32_0 = arith.constant 0 : i32
    %c0_i32_1 = arith.constant 0 : i32
    return %c0_i32, %c0_i32_0 : i32, i32
  }
  func.func @transform_5(%arg0: i32) -> (i32, i32) {
    %c0_i32 = arith.constant 0 : i32
    %c0_i32_0 = arith.constant 0 : i32
    %c0_i32_1 = arith.constant 0 : i32
    return %c0_i32, %c0_i32_0 : i32, i32
  }
  func.func @transform_6(%arg0: i32) -> (i32, i32) {
    %c0_i32 = arith.constant 0 : i32
    %c0_i32_0 = arith.constant 0 : i32
    %c0_i32_1 = arith.constant 0 : i32
    return %c0_i32, %c0_i32_0 : i32, i32
  }
  func.func @transform_7(%arg0: i32) -> (i32, i32) {
    %c0_i32 = arith.constant 0 : i32
    %c0_i32_0 = arith.constant 0 : i32
    %c0_i32_1 = arith.constant 0 : i32
    return %c0_i32, %c0_i32_0 : i32, i32
  }
  func.func @transform_8(%arg0: i32) -> (i32, i32) {
    %c0_i32 = arith.constant 0 : i32
    %c0_i32_0 = arith.constant 0 : i32
    %c0_i32_1 = arith.constant 0 : i32
    return %c0_i32, %c0_i32_0 : i32, i32
  }
  func.func @transform_9(%arg0: i32) -> (i32, i32) {
    %c0_i32 = arith.constant 0 : i32
    %c0_i32_0 = arith.constant 0 : i32
    %c0_i32_1 = arith.constant 0 : i32
    return %c0_i32, %c0_i32_0 : i32, i32
  }
  func.func @transform_10(%arg0: i32) -> (i32, i32) {
    %c0_i32 = arith.constant 0 : i32
    %c0_i32_0 = arith.constant 0 : i32
    %c0_i32_1 = arith.constant 0 : i32
    return %c0_i32, %c0_i32_0 : i32, i32
  }
  func.func @transform_11(%arg0: i32) -> (i32, i32) {
    %c0_i32 = arith.constant 0 : i32
    %c0_i32_0 = arith.constant 0 : i32
    %c0_i32_1 = arith.constant 0 : i32
    return %c0_i32, %c0_i32_0 : i32, i32
  }
  func.func @transform_12(%arg0: i32) -> (i32, i32) {
    %c0_i32 = arith.constant 0 : i32
    %c0_i32_0 = arith.constant 0 : i32
    %c0_i32_1 = arith.constant 0 : i32
    return %c0_i32, %c0_i32_0 : i32, i32
  }
  func.func @transform_13(%arg0: i32) -> (i32, i32) {
    %c0_i32 = arith.constant 0 : i32
    %c0_i32_0 = arith.constant 0 : i32
    %c0_i32_1 = arith.constant 0 : i32
    return %c0_i32, %c0_i32_0 : i32, i32
  }
  func.func @transform_14(%arg0: i32) -> (i32, i32) {
    %c0_i32 = arith.constant 0 : i32
    %c0_i32_0 = arith.constant 0 : i32
    %c0_i32_1 = arith.constant 0 : i32
    return %c0_i32, %c0_i32_0 : i32, i32
  }
  func.func @transform_15(%arg0: i32) -> (i32, i32) {
    %c0_i32 = arith.constant 0 : i32
    %c0_i32_0 = arith.constant 0 : i32
    %c0_i32_1 = arith.constant 0 : i32
    return %c0_i32, %c0_i32_0 : i32, i32
  }
  func.func @transform_16(%arg0: i32) -> (i32, i32) {
    %c0_i32 = arith.constant 0 : i32
    %c0_i32_0 = arith.constant 0 : i32
    return %arg0, %c0_i32 : i32, i32
  }
}

</mosaic_0001>

<bundles_post_ra>
// kernel: tpu_custom_call.1
= control target key start
LH: loop header
LB: loop body
LE: loop exit
PB: predicated region body
PF: predicated region fallthrough
CT: control target
= control target key end

     0   :  { %s2919_s21 = smov 0   ;;  %s3255_s0 = inlined_call_operand.vmem [shape: f32[256,24], index: 0, kind: input, shape index: {}]   ;;  %s3256_s1 = inlined_call_operand.vmem [shape: f32[256,2], index: 1, kind: input, shape index: {}]   ;;  %s3257_s2 = inlined_call_operand.vmem [shape: bf16[24,96], index: 2, kind: input, shape index: {}]   ;;  %s3258_s3 = inlined_call_operand.vmem [shape: f32[1,96], index: 3, kind: input, shape index: {}]   ;;  %s3259_s4 = inlined_call_operand.vmem [shape: bf16[64,32], index: 4, kind: input, shape index: {}]   ;;  %s3260_s5 = inlined_call_operand.vmem [shape: f32[1,32], index: 5, kind: input, shape index: {}]   ;;  %s3261_s6 = inlined_call_operand.vmem [shape: bf16[2,64], index: 6, kind: input, shape index: {}]   ;;  %s3262_s7 = inlined_call_operand.vmem [shape: f32[1,64], index: 7, kind: input, shape index: {}]   ;;  %s3263_s8 = inlined_call_operand.vmem [shape: bf16[64,16], index: 8, kind: input, shape index: {}]   ;;  %s3264_s9 = inlined_call_operand.vmem [shape: f32[1,16], index: 9, kind: input, shape index: {}]   ;;  %s3265_s10 = inlined_call_operand.vmem [shape: bf16[16,32], index: 10, kind: input, shape index: {}]   ;;  %s3266_s11 = inlined_call_operand.vmem [shape: f32[1,32], index: 11, kind: input, shape index: {}]   ;;  %s3267_s12 = inlined_call_operand.vmem [shape: bf16[96,32], index: 12, kind: input, shape index: {}]   ;;  %s3268_s13 = inlined_call_operand.vmem [shape: f32[1,32], index: 13, kind: input, shape index: {}]   ;;  %s3269_s14 = inlined_call_operand.vmem [shape: bf16[32,3], index: 14, kind: input, shape index: {}]   ;;  %s3270_s15 = inlined_call_operand.vmem [shape: f32[1,3], index: 15, kind: input, shape index: {}]   ;;  %s3271_s16 = inlined_call_operand.vmem [shape: f32[256,3], index: 16, kind: output, shape index: {}]  }
   0x1   :  { %3272 = sst [smem:[#allocation2_spill]] %s3255_s0 }
   0x2 LB: > { %s2326_s22 = sadd.s32 4294967295, %s2830_s21   ;;  %p2330_p0 = scmp.ge.s32.totalorder %s2830_s21, 1  ;;  %s2830_s21 = sphi %s2919_s21, %s26_s21  }
   0x3   : > { %p474_p1 = scmp.lt.s32.totalorder %s2830_s21, 3 }
   0x5   : > { %p475_p2 = pnand %p2330_p0, %p474_p1 }
   0x6   : > { %v2805_v0 = vld [vmem:[%s3257_s2] sm:$0xff] (!%p475_p2)   ;;  %vm632_vm0 = vcmask (!%p475_p2), 1043456   ;;  %v2806_v1 = vld [vmem:[%s3257_s2 + $0x8] ss:$0 sps:$4 sm:$0xff] (!%p475_p2)   ;;  %vm975_vm1 = vcmask (!%p475_p2), 1040384   ;;  %s2331_s29 = sshll.u32 (!%p475_p2), %s2326_s22, 4 }
   0x7   : > { %478 = sbr.rel (%p475_p2) target bundleno = 1403 (0x57b), region = 84  ;;  %v934_v2 = vld [vmem:[%s3261_s6] sm:$0x1] (!%p475_p2)  ;;  %2545 = vmatprep.subr.bf16.mxu1 (!%p475_p2), %v2805_v0  ;;  %p530_p3 = scmp.lt.s32.totalorder (!%p475_p2), %s2331_s29, 31  ;;  %v634_v4 = vsel (!%p475_p2), %vm632_vm0, %v2806_v1, 0  ;;  %vm607_vm2 = vcmask (!%p475_p2), 195584  }
   0x8   : > { %2546 = vmatpush3.bf16.msra.mxu1 (!%p475_p2), %v2805_v0  ;;  %2794 = vmatprep.subr.msk.bf16.mxu0 (!%p475_p2), %vm975_vm1, %v934_v2  ;;  %v977_v3 = vsel (!%p475_p2), %vm975_vm1, %v934_v2, 0  ;;  %v2807_v5 = vld [vmem:[%s3259_s4] sm:$0xff] (!%p475_p2)   ;;  %s3273_s20 = sld [smem:[#allocation2_spill]] (!%p475_p2)  ;;  %vm950_vm3 = vcmask (!%p475_p2), 15360   ;;  %v2808_v13 = vld [vmem:[%s3259_s4 + $0x8] sm:$0xff] (!%p475_p2)   ;;  %v2809_v25 = vld [vmem:[%s3259_s4 + $0x10] sm:$0xff] (!%p475_p2)  }
   0x9   : > { %2793 = vmatprep.subr.msk.bf16.mxu1 (!%p475_p2), %vm632_vm0, %v2806_v1  ;;  %2590 = vmatpush3.bf16.msra.mxu0 (!%p475_p2), %v977_v3  ;;  %v2810_v56 = vld [vmem:[%s3259_s4 + $0x18] sm:$0xff] (!%p475_p2)   ;;  %v3013_v57 = vld [vmem:[%s3258_s3] ss:$0 sm:$0xff] (!%p475_p2)  ;;  %vm796_vm4 = vcmask (!%p475_p2), 523264   ;;  %s2832_s23 = smov (!%p475_p2), 96   ;;  %vm1128_vm5 = vcmask (!%p475_p2), 261120  }
   0xa   : > { %v3018_v59 = vld [vmem:[%s3262_s7] ss:$0 sm:$0xff] (!%p475_p2)  ;;  %s2833_s28 = smov (!%p475_p2), 64   ;;  %vm1429_vm6 = vcmask (!%p475_p2), 130048   ;;  %vm2241_vm7 = vcmask (!%p475_p2), 23552  }
   0xc   : > { %2548 = vmatpush3.bf16.msra.mxu1 (!%p475_p2), %v634_v4 }
   0xd   : > { %2565 = vmatprep.subr.bf16.mxu1 (!%p475_p2), %v2807_v5 }
   0xe   : > { %s3275_s29 = smov (!%p530_p3, %s2331_s29), 31 }
   0xf   : > { %s2939_s17 = sshll.u32 %s3275_s29, 3 }
  0x10   : > { %s2945_s22 = scalar_lea.vmem %s3273_s20, %s2939_s17  ;;  %s2951_s25 = scalar_lea.vmem %s3256_s1, %s2939_s17 }
  0x11   : > { %v548_v6 = vld [vmem:[%s2945_s22] sm:$0xff]  ;;  %v549_v7 = vld [vmem:[%s2945_s22 + $0x8] sm:$0xff]  ;;  %v550_v11 = vld [vmem:[%s2945_s22 + $0x10] sm:$0xff]  ;;  %s3218_s24 = scalar_lea.vmem %s3271_s16, %s2939_s17 }
  0x12   : > { %v564_v8 = vld [vmem:[%s2951_s25] sm:$0xff]  ;;  %v583_v9 = vpack.c.bf16 %v549_v7, %v548_v6  ;;  %v565_v10 = vld [vmem:[%s2951_s25 + $0x8] sm:$0xff]  ;;  %v551_v12 = vld [vmem:[%s2945_s22 + $0x18] sm:$0xff] }
  0x13   : > { %v935_v14 = vpack.c.bf16 %v565_v10, %v564_v8  ;;  %v584_v15 = vpack.c.bf16 %v551_v12, %v550_v11  ;;  %v566_v16 = vld [vmem:[%s2951_s25 + $0x10] sm:$0xff]  ;;  %v567_v17 = vld [vmem:[%s2951_s25 + $0x18] sm:$0xff]  ;;  %v552_v18 = vld [vmem:[%s2945_s22 + $0x20] sm:$0xff] }
  0x14   : > { %2549 = vmatprep.mubr.msk.bf16.mxu1 %vm607_vm2, %v583_v9  ;;  %v936_v19 = vpack.c.bf16 %v567_v17, %v566_v16  ;;  %v553_v20 = vld [vmem:[%s2945_s22 + $0x28] sm:$0xff]  ;;  %v568_v21 = vld [vmem:[%s2951_s25 + $0x20] sm:$0xff]  ;;  %v554_v26 = vld [vmem:[%s2945_s22 + $0x30] sm:$0xff] }
  0x15   : > { %v569_v22 = vld [vmem:[%s2951_s25 + $0x28] sm:$0xff]  ;;  %2591 = vmatprep.mubr.msk.bf16.mxu0 %vm950_vm3, %v935_v14  ;;  %2550 = vmatmul.mubr.msk.bf16.vlgmr.msra.gmra.mrb[0].mxu1 %vm607_vm2, %v584_v15  ;;  %v585_v23 = vpack.c.bf16 %v553_v20, %v552_v18  ;;  %v555_v27 = vld [vmem:[%s2945_s22 + $0x38] sm:$0xff]  ;;  %v570_v28 = vld [vmem:[%s2951_s25 + $0x30] sm:$0xff] }
  0x16   : > { %v937_v24 = vpack.c.bf16 %v569_v22, %v568_v21  ;;  %2592 = vmatmul.mubr.msk.bf16.vlgmr.msra.gmra.mrb[0].mxu0 %vm950_vm3, %v936_v19  ;;  %2566 = vmatpush3.bf16.msra.mxu1 %v2807_v5  ;;  %v571_v29 = vld [vmem:[%s2951_s25 + $0x38] sm:$0xff]  ;;  %v556_v30 = vld [vmem:[%s2945_s22 + $0x40] sm:$0xff]  ;;  %v557_v31 = vld [vmem:[%s2945_s22 + $0x48] sm:$0xff]  ;;  %v586_v34 = vpack.c.bf16 %v555_v27, %v554_v26 }
  0x17   : > { %2553 = vmatprep.mubr.msk.bf16.mxu1 %vm607_vm2, %v585_v23  ;;  %v572_v32 = vld [vmem:[%s2951_s25 + $0x40] sm:$0xff]  ;;  %v573_v33 = vld [vmem:[%s2951_s25 + $0x48] sm:$0xff]  ;;  %2567 = vmatprep.subr.bf16.mxu1 %v2808_v13  ;;  %v938_v35 = vpack.c.bf16 %v571_v29, %v570_v28  ;;  %v587_v36 = vpack.c.bf16 %v557_v31, %v556_v30  ;;  %v558_v38 = vld [vmem:[%s2945_s22 + $0x50] sm:$0xff] }
  0x18   : > { %2595 = vmatprep.mubr.msk.bf16.mxu0 %vm950_vm3, %v937_v24  ;;  %v939_v37 = vpack.c.bf16 %v573_v33, %v572_v32  ;;  %v559_v39 = vld [vmem:[%s2945_s22 + $0x58] sm:$0xff]  ;;  %v574_v40 = vld [vmem:[%s2951_s25 + $0x50] sm:$0xff]  ;;  %v560_v42 = vld [vmem:[%s2945_s22 + $0x60] sm:$0xff] }
  0x19   : > { %v575_v41 = vld [vmem:[%s2951_s25 + $0x58] sm:$0xff]  ;;  %v561_v43 = vld [vmem:[%s2945_s22 + $0x68] sm:$0xff]  ;;  %v576_v44 = vld [vmem:[%s2951_s25 + $0x60] sm:$0xff]  ;;  %v588_v46 = vpack.c.bf16 %v559_v39, %v558_v38 }
  0x1a   : > { %2568 = vmatpush3.bf16.msra.mxu1 %v2808_v13  ;;  %v577_v45 = vld [vmem:[%s2951_s25 + $0x68] sm:$0xff]  ;;  %v940_v47 = vpack.c.bf16 %v575_v41, %v574_v40  ;;  %v589_v48 = vpack.c.bf16 %v561_v43, %v560_v42  ;;  %v562_v50 = vld [vmem:[%s2945_s22 + $0x70] sm:$0xff]  ;;  %v563_v51 = vld [vmem:[%s2945_s22 + $0x78] sm:$0xff] }
  0x1b   : > { %2569 = vmatprep.subr.bf16.mxu1 %v2809_v25  ;;  %v941_v49 = vpack.c.bf16 %v577_v45, %v576_v44  ;;  %v578_v52 = vld [vmem:[%s2951_s25 + $0x70] sm:$0xff]  ;;  %v579_v53 = vld [vmem:[%s2951_s25 + $0x78] sm:$0xff]  ;;  %v590_v54 = vpack.c.bf16 %v563_v51, %v562_v50 }
  0x1c   : > { %v942_v55 = vpack.c.bf16 %v579_v53, %v578_v52 }
  0x1d   : > { %2554 = vmatmul.mubr.msk.bf16.gmra.mrb[4].mxu1 %vm607_vm2, %v586_v34 }
  0x1e   : > { %2596 = vmatmul.mubr.msk.bf16.gmra.mrb[4].mxu0 %vm950_vm3, %v938_v35  ;;  %2557 = vmatprep.mubr.msk.bf16.mxu1 %vm607_vm2, %v587_v36 }
  0x1f   : > { %2599 = vmatprep.mubr.msk.bf16.mxu0 %vm950_vm3, %v939_v37  ;;  %2570 = vmatpush3.bf16.msra.mxu1 %v2809_v25 }
  0x20   : > { %2571 = vmatprep.subr.bf16.mxu1 %v2810_v56 }
  0x23   : > { %2572 = vmatpush3.bf16.msra.mxu1 %v2810_v56 }
  0x25   : > { %2558 = vmatmul.mubr.msk.bf16.gmra.mrb[8].mxu1 %vm607_vm2, %v588_v46 }
  0x26   : > { %2600 = vmatmul.mubr.msk.bf16.gmra.mrb[8].mxu0 %vm950_vm3, %v940_v47  ;;  %2561 = vmatprep.mubr.msk.bf16.mxu1 %vm607_vm2, %v589_v48 }
  0x27   : > { %2603 = vmatprep.mubr.msk.bf16.mxu0 %vm950_vm3, %v941_v49 }
  0x2d   : > { %2562 = vmatmul.mubr.msk.bf16.gmra.mrb[12].mxu1 %vm607_vm2, %v590_v54 }
  0x2e   : > { %2604 = vmatmul.mubr.msk.bf16.gmra.mrb[12].mxu0 %vm950_vm3, %v942_v55 }
  0xe8   : > { %v2551_v58 = vpop.f32.mrb[0].mxu1 }
  0xe9   : > { %v679_v60 = vadd.f32 %v2551_v58, %v3013_v57  ;;  %v670_v61 = vpop.f32.mrb[1].mxu1  ;;  %v2593_v62 = vpop.f32.mrb[0].mxu0 }
  0xea   : > { %v671_v63 = vadd.f32 %v3013_v57, %v670_v61  ;;  %v2552_v0 = vpop.f32.mrb[2].mxu1  ;;  %v1022_v1 = vadd.f32 %v2593_v62, %v3018_v59  ;;  %v1013_v2 = vpop.f32.mrb[1].mxu0 }
  0xeb   : > { %v682_v3 = vadd.f32 %v2552_v0, %v3013_v57  ;;  %v673_v4 = vpop.f32.mrb[3].mxu1  ;;  %v1014_v5 = vadd.f32 %v3018_v59, %v1013_v2  ;;  %v2594_v6 = vpop.f32.mrb[2].mxu0  ;;  %v735_v11 = vmax.f32 %v679_v60, 0.0 }
  0xec   : > { %v674_v7 = vadd.f32 %v3013_v57, %v673_v4  ;;  %v1078_v8 = vmax.f32 %v1022_v1, 0.0  ;;  %v1025_v9 = vadd.f32 %v2594_v6, %v3018_v59  ;;  %v1016_v10 = vpop.f32.mrb[3].mxu0  ;;  %v733_v15 = vmax.f32 %v671_v63, 0.0 }
  0xed   : > { %v736_v12 = vmax.f32 %v682_v3, 0.0  ;;  %v1076_v13 = vmax.f32 %v1014_v5, 0.0  ;;  %v1017_v14 = vadd.f32 %v3018_v59, %v1016_v10 }
  0xee   : > { %v734_v16 = vmax.f32 %v674_v7, 0.0  ;;  %v1079_v17 = vmax.f32 %v1025_v9, 0.0 }
  0xef   : > { %v3028_v18 = vpack.c.bf16 %v736_v12, %v735_v11  ;;  %v1077_v19 = vmax.f32 %v1017_v14, 0.0 }
  0xf0   : > { %v3030_v20 = vpack.c.bf16 %v734_v16, %v733_v15  ;;  %v2555_v21 = vpop.f32.mrb[4].mxu1  ;;  %v3032_v22 = vpack.c.bf16 %v1079_v17, %v1078_v8 }
  0xf1   : > { %v695_v23 = vadd.f32 %v2555_v21, %v3013_v57  ;;  %v686_v24 = vpop.f32.mrb[5].mxu1  ;;  %v2597_v25 = vpop.f32.mrb[4].mxu0  ;;  %v3035_v26 = vpack.c.bf16 %v1077_v19, %v1076_v13 }
  0xf2   : > { %v687_v27 = vadd.f32 %v3013_v57, %v686_v24  ;;  %v2556_v28 = vpop.f32.mrb[6].mxu1  ;;  %2573 = vmatprep.mubr.msk.bf16.mxu1 %vm796_vm4, %v3030_v20  ;;  %v1038_v29 = vadd.f32 %v2597_v25, %v3018_v59  ;;  %v1029_v30 = vpop.f32.mrb[5].mxu0 }
  0xf3   : > { %v698_v31 = vadd.f32 %v2556_v28, %v3013_v57  ;;  %v689_v32 = vpop.f32.mrb[7].mxu1  ;;  %2574 = vmatmul.mubr.msk.bf16.vlgmr.msra.gmra.mrb[16].mxu1 %vm796_vm4, %v3028_v18  ;;  %v1030_v33 = vadd.f32 %v3018_v59, %v1029_v30  ;;  %v2598_v34 = vpop.f32.mrb[6].mxu0  ;;  %1591 = vrot.lane.b32.xlu0 %v3035_v26, %s2832_s23  ;;  %v739_v39 = vmax.f32 %v695_v23, 0.0 }
  0xf4   : > { %v690_v35 = vadd.f32 %v3013_v57, %v689_v32  ;;  %v1082_v36 = vmax.f32 %v1038_v29, 0.0  ;;  %v1041_v37 = vadd.f32 %v2598_v34, %v3018_v59  ;;  %v1032_v38 = vpop.f32.mrb[7].mxu0  ;;  %v737_v43 = vmax.f32 %v687_v27, 0.0 }
  0xf5   : > { %v740_v40 = vmax.f32 %v698_v31, 0.0  ;;  %v1080_v41 = vmax.f32 %v1030_v33, 0.0  ;;  %v1033_v42 = vadd.f32 %v3018_v59, %v1032_v38 }
  0xf6   : > { %v738_v44 = vmax.f32 %v690_v35, 0.0  ;;  %v1083_v45 = vmax.f32 %v1041_v37, 0.0 }
  0xf7   : > { %v3050_v46 = vpack.c.bf16 %v740_v40, %v739_v39  ;;  %v1081_v47 = vmax.f32 %v1033_v42, 0.0  ;;  %1593 = vrot.lane.b32.xlu0 %v3032_v22, %s2832_s23 }
  0xf8   : > { %v3054_v48 = vpack.c.bf16 %v738_v44, %v737_v43  ;;  %v3056_v49 = vpack.c.bf16 %v1083_v45, %v1082_v36  ;;  %v2559_v50 = vpop.f32.mrb[8].mxu1 }
  0xf9   : > { %v711_v51 = vadd.f32 %v2559_v50, %v3013_v57  ;;  %v702_v52 = vpop.f32.mrb[9].mxu1  ;;  %v2601_v53 = vpop.f32.mrb[8].mxu0  ;;  %v3059_v54 = vpack.c.bf16 %v1081_v47, %v1080_v41 }
  0xfa   : > { %v703_v55 = vadd.f32 %v3013_v57, %v702_v52  ;;  %v2560_v56 = vpop.f32.mrb[10].mxu1  ;;  %2577 = vmatprep.mubr.msk.bf16.mxu1 %vm796_vm4, %v3054_v48  ;;  %v1054_v58 = vadd.f32 %v2601_v53, %v3018_v59  ;;  %v1045_v60 = vpop.f32.mrb[9].mxu0  ;;  %v2813_v52 = vld [vmem:[%s3263_s8] sm:$0xff]  }
  0xfb   : > { %v714_v61 = vadd.f32 %v2560_v56, %v3013_v57  ;;  %v705_v62 = vpop.f32.mrb[11].mxu1  ;;  %2578 = vmatmul.mubr.msk.bf16.gmra.mrb[20].mxu1 %vm796_vm4, %v3050_v46  ;;  %v1046_v63 = vadd.f32 %v3018_v59, %v1045_v60  ;;  %1595 = vrot.lane.b32.xlu1 %v3059_v54, %s2832_s23  ;;  %v2602_v0 = vpop.f32.mrb[10].mxu0  ;;  %v743_v5 = vmax.f32 %v711_v51, 0.0 }
  0xfc   : > { %v706_v1 = vadd.f32 %v3013_v57, %v705_v62  ;;  %v1086_v2 = vmax.f32 %v1054_v58, 0.0  ;;  %v1057_v3 = vadd.f32 %v2602_v0, %v3018_v59  ;;  %v1048_v4 = vpop.f32.mrb[11].mxu0  ;;  %v741_v9 = vmax.f32 %v703_v55, 0.0 }
  0xfd   : > { %v744_v6 = vmax.f32 %v714_v61, 0.0  ;;  %v1084_v7 = vmax.f32 %v1046_v63, 0.0  ;;  %v1049_v8 = vadd.f32 %v3018_v59, %v1048_v4 }
  0xfe   : > { %v742_v10 = vmax.f32 %v706_v1, 0.0  ;;  %v1087_v11 = vmax.f32 %v1057_v3, 0.0 }
  0xff   : > { %v762_v12 = vpack.c.bf16 %v744_v6, %v743_v5  ;;  %v1085_v13 = vmax.f32 %v1049_v8, 0.0  ;;  %1597 = vrot.lane.b32.xlu1 %v3056_v49, %s2832_s23 }
 0x100   : > { %v761_v14 = vpack.c.bf16 %v742_v10, %v741_v9  ;;  %v3076_v15 = vpack.c.bf16 %v1087_v11, %v1086_v2  ;;  %v2563_v16 = vpop.f32.mrb[12].mxu1 }
 0x101   : > { %v1112_v17 = vpack.c.bf16 %v1085_v13, %v1084_v7  ;;  %v727_v19 = vadd.f32 %v2563_v16, %v3013_v57  ;;  %v2605_v21 = vpop.f32.mrb[12].mxu0  ;;  %v718_v23 = vpop.f32.mrb[13].mxu1 }
 0x102   : > { %v1070_v24 = vadd.f32 %v2605_v21, %v3018_v59  ;;  %v1061_v25 = vpop.f32.mrb[13].mxu0  ;;  %v719_v27 = vadd.f32 %v3013_v57, %v718_v23  ;;  %v2564_v28 = vpop.f32.mrb[14].mxu1  ;;  %2581 = vmatprep.mubr.msk.bf16.mxu1 %vm796_vm4, %v761_v14 }
 0x103   : > { %v1062_v29 = vadd.f32 %v3018_v59, %v1061_v25  ;;  %v2606_v30 = vpop.f32.mrb[14].mxu0  ;;  %v730_v31 = vadd.f32 %v2564_v28, %v3013_v57  ;;  %v721_v32 = vpop.f32.mrb[15].mxu1  ;;  %2582 = vmatmul.mubr.msk.bf16.gmra.mrb[24].mxu1 %vm796_vm4, %v762_v12  ;;  %1601 = vrot.lane.b32.xlu1 %v3076_v15, %s2832_s23  ;;  %v747_v37 = vmax.f32 %v727_v19, 0.0 }
 0x104   : > { %v1090_v33 = vmax.f32 %v1070_v24, 0.0  ;;  %v1073_v34 = vadd.f32 %v2606_v30, %v3018_v59  ;;  %v722_v35 = vadd.f32 %v3013_v57, %v721_v32  ;;  %v1064_v36 = vpop.f32.mrb[15].mxu0  ;;  %1599 = vrot.lane.b32.xlu0 %v1112_v17, %s2832_s23  ;;  %v745_v41 = vmax.f32 %v719_v27, 0.0  ;;  %v2811_v57 = vld [vmem:[%s3263_s8 + $0x10] sm:$0xff]  }
 0x105   : > { %v1088_v38 = vmax.f32 %v1062_v29, 0.0  ;;  %v748_v39 = vmax.f32 %v730_v31, 0.0  ;;  %v1065_v40 = vadd.f32 %v3018_v59, %v1064_v36  ;;  %v2812_v59 = vld [vmem:[%s3263_s8 + $0x18] sm:$0xff]   ;;  %2607 = vmatprep.subr.bf16.mxu1 %v2811_v57 }
 0x106   : > { %v1091_v42 = vmax.f32 %v1073_v34, 0.0  ;;  %v746_v43 = vmax.f32 %v722_v35, 0.0  ;;  %2608 = vmatpush3.bf16.msra.mxu1 %v2811_v57  ;;  %v2390_v57 = vld [vmem:[%s3264_s9] ss:$0 sm:$0xff] }
 0x107   : > { %v764_v44 = vpack.c.bf16 %v748_v39, %v747_v37  ;;  %v1089_v45 = vmax.f32 %v1065_v40, 0.0  ;;  %2609 = vmatprep.subr.bf16.mxu1 %v2812_v59 }
 0x108   : > { %v1115_v47 = vpack.c.bf16 %v1091_v42, %v1090_v33  ;;  %v763_v50 = vpack.c.bf16 %v746_v43, %v745_v41 }
 0x109   : > { %v1114_v51 = vpack.c.bf16 %v1089_v45, %v1088_v38 }
 0x10a   : > { %1605 = vrot.lane.b32.xlu1 %v1115_v47, %s2832_s23  ;;  %2585 = vmatprep.mubr.msk.bf16.mxu1 %vm796_vm4, %v763_v50 }
 0x10b   : > { %1603 = vrot.lane.b32.xlu0 %v1114_v51, %s2832_s23  ;;  %2586 = vmatmul.mubr.msk.bf16.gmra.mrb[28].mxu1 %vm796_vm4, %v764_v44 }
 0x10c   : > { %2611 = vmatprep.mubr.msk.bf16.mxu1 %vm1128_vm5, %v3035_v26  ;;  %2610 = vmatpush3.bf16.msra.mxu1 %v2812_v59 }
 0x10d   : > { %2627 = vmatprep.subr.bf16.mxu1 %v2813_v52 }
 0x10e   : > { %1887 = vrot.lane.b32.xlu1 %v3028_v18, %s2833_s28  ;;  %v2814_v18 = vld [vmem:[%s3263_s8 + $0x8] sm:$0xff]  }
 0x10f   : > { %1885 = vrot.lane.b32.xlu0 %v3030_v20, %s2833_s28  ;;  %v2815_v20 = vld [vmem:[%s3265_s10] sm:$0xff]  }
 0x110   : > { %2647 = vmatprep.subr.bf16.mxu0 %v2815_v20 }
 0x111   : > { %2648 = vmatpush3.bf16.msra.mxu0 %v2815_v20 }
 0x112   : > { %1891 = vrot.lane.b32.xlu1 %v3050_v46, %s2833_s28 }
 0x113   : > { %1889 = vrot.lane.b32.xlu0 %v3054_v48, %s2833_s28  ;;  %2612 = vmatmul.mubr.msk.bf16.vlgmr.msra.gmra.mrb[32].mxu1 %vm1128_vm5, %v3032_v22  ;;  %v2348_v22 = vld [vmem:[%s3260_s5] ss:$0 sm:$0xff] }
 0x114   : > { %2628 = vmatpush3.bf16.msra.mxu1 %v2813_v52  ;;  %2615 = vmatprep.mubr.msk.bf16.mxu1 %vm1128_vm5, %v3059_v54 }
 0x115   : > { %2629 = vmatprep.subr.bf16.mxu1 %v2814_v18 }
 0x116   : > { %1895 = vrot.lane.b32.xlu1 %v762_v12, %s2833_s28 }
 0x117   : > { %1893 = vrot.lane.b32.xlu0 %v761_v14, %s2833_s28 }
 0x118   : > { %2630 = vmatpush3.bf16.msra.mxu1 %v2814_v18 }
 0x11a   : > { %1899 = vrot.lane.b32.xlu1 %v764_v44, %s2833_s28 }
 0x11b   : > { %1897 = vrot.lane.b32.xlu0 %v763_v50, %s2833_s28  ;;  %2616 = vmatmul.mubr.msk.bf16.gmra.mrb[36].mxu1 %vm1128_vm5, %v3056_v49  ;;  %v2816_v50 = vld [vmem:[%s3267_s12 + $0x10] sm:$0xff]  }
 0x11c   : > { %2619 = vmatprep.mubr.msk.bf16.mxu1 %vm1128_vm5, %v1112_v17  ;;  %2665 = vmatprep.subr.bf16.mxu0 %v2816_v50 }
 0x123   : > { %2620 = vmatmul.mubr.msk.bf16.gmra.mrb[40].mxu1 %vm1128_vm5, %v3076_v15 }
 0x124   : > { %2623 = vmatprep.mubr.msk.bf16.mxu1 %vm1128_vm5, %v1114_v51 }
 0x12b   : > { %2624 = vmatmul.mubr.msk.bf16.gmra.mrb[44].mxu1 %vm1128_vm5, %v1115_v47 }
 0x1c6   : > { %v2575_v26 = vpop.f32.mrb[16].mxu1 }
 0x1c7   : > { %v864_v46 = vadd.f32 %v2575_v26, %v2348_v22  ;;  %v855_v48 = vpop.f32.mrb[17].mxu1 }
 0x1c8   : > { %v856_v49 = vadd.f32 %v2348_v22, %v855_v48  ;;  %v2576_v53 = vpop.f32.mrb[18].mxu1 }
 0x1c9   : > { %v867_v54 = vadd.f32 %v2576_v53, %v2348_v22  ;;  %v858_v55 = vpop.f32.mrb[19].mxu1  ;;  %v920_v58 = vmax.f32 %v864_v46, 0.0  ;;  %v2817_v53 = vld [vmem:[%s3267_s12 + $0x18] sm:$0xff]  }
 0x1ca   : > { %v859_v56 = vadd.f32 %v2348_v22, %v858_v55  ;;  %v918_v61 = vmax.f32 %v856_v49, 0.0 }
 0x1cb   : > { %v921_v60 = vmax.f32 %v867_v54, 0.0 }
 0x1cc   : > { %v919_v62 = vmax.f32 %v859_v56, 0.0 }
 0x1cd   : > { %v1097_v63 = vpack.c.bf16 %v921_v60, %v920_v58 }
 0x1ce   : > { %v1096_v0 = vpack.c.bf16 %v919_v62, %v918_v61  ;;  %v2579_v1 = vpop.f32.mrb[20].mxu1  ;;  %v2818_v62 = vld [vmem:[%s3267_s12] sm:$0xff]  }
 0x1cf   : > { %v880_v2 = vadd.f32 %v2579_v1, %v2348_v22  ;;  %v871_v3 = vpop.f32.mrb[21].mxu1 }
 0x1d0   : > { %v872_v4 = vadd.f32 %v2348_v22, %v871_v3  ;;  %v2580_v5 = vpop.f32.mrb[22].mxu1  ;;  %2631 = vmatprep.mubr.msk.bf16.mxu1 %vm1128_vm5, %v1096_v0 }
 0x1d1   : > { %v883_v6 = vadd.f32 %v2580_v5, %v2348_v22  ;;  %v874_v7 = vpop.f32.mrb[23].mxu1  ;;  %2632 = vmatmul.mubr.msk.bf16.vlgmr.msra.gmra.mrb[32].mxu1 %vm1128_vm5, %v1097_v63  ;;  %v924_v9 = vmax.f32 %v880_v2, 0.0 }
 0x1d2   : > { %v875_v8 = vadd.f32 %v2348_v22, %v874_v7  ;;  %v922_v11 = vmax.f32 %v872_v4, 0.0 }
 0x1d3   : > { %v925_v10 = vmax.f32 %v883_v6, 0.0 }
 0x1d4   : > { %v923_v12 = vmax.f32 %v875_v8, 0.0 }
 0x1d5   : > { %v1099_v13 = vpack.c.bf16 %v925_v10, %v924_v9 }
 0x1d6   : > { %v1098_v14 = vpack.c.bf16 %v923_v12, %v922_v11  ;;  %v2583_v15 = vpop.f32.mrb[24].mxu1 }
 0x1d7   : > { %v896_v16 = vadd.f32 %v2583_v15, %v2348_v22  ;;  %v887_v17 = vpop.f32.mrb[25].mxu1 }
 0x1d8   : > { %v888_v19 = vadd.f32 %v2348_v22, %v887_v17  ;;  %v2584_v21 = vpop.f32.mrb[26].mxu1  ;;  %2635 = vmatprep.mubr.msk.bf16.mxu1 %vm1128_vm5, %v1098_v14 }
 0x1d9   : > { %v899_v23 = vadd.f32 %v2584_v21, %v2348_v22  ;;  %v890_v24 = vpop.f32.mrb[27].mxu1  ;;  %2636 = vmatmul.mubr.msk.bf16.gmra.mrb[36].mxu1 %vm1128_vm5, %v1099_v13  ;;  %v928_v27 = vmax.f32 %v896_v16, 0.0 }
 0x1da   : > { %v891_v25 = vadd.f32 %v2348_v22, %v890_v24  ;;  %v926_v29 = vmax.f32 %v888_v19, 0.0 }
 0x1db   : > { %v929_v28 = vmax.f32 %v899_v23, 0.0 }
 0x1dc   : > { %v927_v30 = vmax.f32 %v891_v25, 0.0 }
 0x1dd   : > { %v1101_v31 = vpack.c.bf16 %v929_v28, %v928_v27  ;;  %v1592_v27 = vpop.permute.xlu0 %1591  ;;  %v2819_v28 = vld [vmem:[%s3267_s12 + $0x8] sm:$0xff]  }
 0x1de   : > { %v1100_v32 = vpack.c.bf16 %v927_v30, %v926_v29  ;;  %v2587_v33 = vpop.f32.mrb[28].mxu1  ;;  %v1596_v30 = vpop.permute.xlu1 %1595 }
 0x1df   : > { %v912_v34 = vadd.f32 %v2587_v33, %v2348_v22  ;;  %v903_v35 = vpop.f32.mrb[29].mxu1 }
 0x1e0   : > { %v904_v36 = vadd.f32 %v2348_v22, %v903_v35  ;;  %v2588_v37 = vpop.f32.mrb[30].mxu1  ;;  %2639 = vmatprep.mubr.msk.bf16.mxu1 %vm1128_vm5, %v1100_v32 }
 0x1e1   : > { %v915_v38 = vadd.f32 %v2588_v37, %v2348_v22  ;;  %v906_v39 = vpop.f32.mrb[31].mxu1  ;;  %2640 = vmatmul.mubr.msk.bf16.gmra.mrb[40].mxu1 %vm1128_vm5, %v1101_v31  ;;  %v932_v41 = vmax.f32 %v912_v34, 0.0  ;;  %v1594_v29 = vpop.permute.xlu0 %1593  ;;  %v2822_v37 = vld [vmem:[%s3269_s14] sm:$0xff]  }
 0x1e2   : > { %v907_v40 = vadd.f32 %v2348_v22, %v906_v39  ;;  %v930_v43 = vmax.f32 %v904_v36, 0.0  ;;  %v1598_v31 = vpop.permute.xlu1 %1597  ;;  %v2820_v36 = vld [vmem:[%s3267_s12 + $0x20] sm:$0xff]   ;;  %2725 = vmatprep.subr.bf16.mxu1 %v2822_v37 }
 0x1e3   : > { %v933_v42 = vmax.f32 %v915_v38, 0.0  ;;  %v2823_v38 = vld [vmem:[%s3269_s14 + $0x8] sm:$0xff]   ;;  %2726 = vmatpush3.bf16.msra.mxu1 %v2822_v37  ;;  %v2391_v39 = vld [vmem:[%s3266_s11] ss:$0 sm:$0xff] }
 0x1e4   : > { %v931_v44 = vmax.f32 %v907_v40, 0.0  ;;  %2727 = vmatprep.subr.bf16.mxu1 %v2823_v38 }
 0x1e5   : > { %v1103_v45 = vpack.c.bf16 %v933_v42, %v932_v41  ;;  %v1600_v32 = vpop.permute.xlu0 %1599 }
 0x1e6   : > { %v1102_v47 = vpack.c.bf16 %v931_v44, %v930_v43  ;;  %v1602_v33 = vpop.permute.xlu1 %1601 }
 0x1e7   : > { %2728 = vmatpush3.bf16.msra.mxu1 %v2823_v38 }
 0x1e8   : > { %2643 = vmatprep.mubr.msk.bf16.mxu1 %vm1128_vm5, %v1102_v47 }
 0x1e9   : > { %2644 = vmatmul.mubr.msk.bf16.gmra.mrb[44].mxu1 %vm1128_vm5, %v1103_v45  ;;  %v1604_v34 = vpop.permute.xlu0 %1603 }
 0x1ea   : > { %v1606_v35 = vpop.permute.xlu1 %1605 }
 0x2a4   : > { %v2633_v51 = vpop.f32.mrb[32].mxu1 }
 0x2a5   : > { %v1320_v59 = vpop.f32.mrb[33].mxu1  ;;  %v1392_v18 = vadd.f32 %v2633_v51, %v2390_v57 }
 0x2a6   : > { %v2634_v52 = vpop.f32.mrb[34].mxu1  ;;  %v1390_v26 = vadd.f32 %v2390_v57, %v1320_v59 }
 0x2a7   : > { %v1393_v20 = vadd.f32 %v2634_v52, %v2390_v57  ;;  %v1323_v22 = vpop.f32.mrb[35].mxu1 }
 0x2a8   : > { %v1391_v46 = vadd.f32 %v2390_v57, %v1323_v22 }
 0x2a9   : > { %v1409_v48 = vpack.c.bf16 %v1393_v20, %v1392_v18 }
 0x2aa   : > { %v1408_v49 = vpack.c.bf16 %v1391_v46, %v1390_v26 }
 0x2ac   : > { %v2637_v54 = vpop.f32.mrb[36].mxu1  ;;  %2649 = vmatprep.mubr.msk.bf16.mxu0 %vm1429_vm6, %v1408_v49 }
 0x2ad   : > { %v1336_v55 = vpop.f32.mrb[37].mxu1  ;;  %2650 = vmatmul.mubr.msk.bf16.vlgmr.msra.gmra.mrb[16].mxu0 %vm1429_vm6, %v1409_v48  ;;  %v1396_v58 = vadd.f32 %v2637_v54, %v2390_v57  ;;  %v2821_v48 = vld [vmem:[%s3267_s12 + $0x28] sm:$0xff]  }
 0x2ae   : > { %v2638_v56 = vpop.f32.mrb[38].mxu1  ;;  %2666 = vmatpush3.bf16.msra.mxu0 %v2816_v50  ;;  %v1394_v63 = vadd.f32 %v2390_v57, %v1336_v55 }
 0x2af   : > { %v1397_v60 = vadd.f32 %v2638_v56, %v2390_v57  ;;  %v1339_v61 = vpop.f32.mrb[39].mxu1  ;;  %2667 = vmatprep.subr.bf16.mxu0 %v2817_v53 }
 0x2b0   : > { %v1395_v0 = vadd.f32 %v2390_v57, %v1339_v61 }
 0x2b1   : > { %v1411_v1 = vpack.c.bf16 %v1397_v60, %v1396_v58 }
 0x2b2   : > { %v1410_v2 = vpack.c.bf16 %v1395_v0, %v1394_v63  ;;  %2668 = vmatpush3.bf16.msra.mxu0 %v2817_v53 }
 0x2b3   : > { %2685 = vmatprep.subr.bf16.mxu0 %v2818_v62 }
 0x2b4   : > { %v2641_v3 = vpop.f32.mrb[40].mxu1  ;;  %2653 = vmatprep.mubr.msk.bf16.mxu0 %vm1429_vm6, %v1410_v2 }
 0x2b5   : > { %v1352_v4 = vpop.f32.mrb[41].mxu1  ;;  %2654 = vmatmul.mubr.msk.bf16.gmra.mrb[20].mxu0 %vm1429_vm6, %v1411_v1  ;;  %v1400_v6 = vadd.f32 %v2641_v3, %v2390_v57 }
 0x2b6   : > { %v2642_v5 = vpop.f32.mrb[42].mxu1  ;;  %v1398_v9 = vadd.f32 %v2390_v57, %v1352_v4 }
 0x2b7   : > { %v1401_v7 = vadd.f32 %v2642_v5, %v2390_v57  ;;  %v1355_v8 = vpop.f32.mrb[43].mxu1 }
 0x2b8   : > { %v1399_v10 = vadd.f32 %v2390_v57, %v1355_v8 }
 0x2b9   : > { %v1413_v11 = vpack.c.bf16 %v1401_v7, %v1400_v6 }
 0x2ba   : > { %v1412_v12 = vpack.c.bf16 %v1399_v10, %v1398_v9 }
 0x2bc   : > { %v2645_v13 = vpop.f32.mrb[44].mxu1  ;;  %2657 = vmatprep.mubr.msk.bf16.mxu0 %vm1429_vm6, %v1412_v12 }
 0x2bd   : > { %v1368_v14 = vpop.f32.mrb[45].mxu1  ;;  %2658 = vmatmul.mubr.msk.bf16.gmra.mrb[24].mxu0 %vm1429_vm6, %v1413_v11  ;;  %v1404_v16 = vadd.f32 %v2645_v13, %v2390_v57 }
 0x2be   : > { %v2646_v15 = vpop.f32.mrb[46].mxu1  ;;  %v1402_v21 = vadd.f32 %v2390_v57, %v1368_v14 }
 0x2bf   : > { %v1405_v17 = vadd.f32 %v2646_v15, %v2390_v57  ;;  %v1371_v19 = vpop.f32.mrb[47].mxu1 }
 0x2c0   : > { %v1403_v23 = vadd.f32 %v2390_v57, %v1371_v19 }
 0x2c1   : > { %v1415_v24 = vpack.c.bf16 %v1405_v17, %v1404_v16 }
 0x2c2   : > { %v1414_v25 = vpack.c.bf16 %v1403_v23, %v1402_v21 }
 0x2c4   : > { %2661 = vmatprep.mubr.msk.bf16.mxu0 %vm1429_vm6, %v1414_v25 }
 0x2c5   : > { %2662 = vmatmul.mubr.msk.bf16.gmra.mrb[28].mxu0 %vm1429_vm6, %v1415_v24 }
 0x2c6   : > { %2669 = vmatprep.mubr.msk.bf16.mxu0 %vm1128_vm5, %v1592_v27 }
 0x2cd   : > { %2670 = vmatmul.mubr.msk.bf16.vlgmr.msra.gmra.mrb[32].mxu0 %vm1128_vm5, %v1594_v29 }
 0x2ce   : > { %2673 = vmatprep.mubr.msk.bf16.mxu0 %vm1128_vm5, %v1596_v30  ;;  %2686 = vmatpush3.bf16.msra.mxu0 %v2818_v62 }
 0x2cf   : > { %2687 = vmatprep.subr.bf16.mxu0 %v2819_v28 }
 0x2d2   : > { %2688 = vmatpush3.bf16.msra.mxu0 %v2819_v28 }
 0x2d3   : > { %2705 = vmatprep.subr.bf16.mxu0 %v2820_v36 }
 0x2d5   : > { %2674 = vmatmul.mubr.msk.bf16.gmra.mrb[36].mxu0 %vm1128_vm5, %v1598_v31 }
 0x2d6   : > { %2677 = vmatprep.mubr.msk.bf16.mxu0 %vm1128_vm5, %v1600_v32 }
 0x2dd   : > { %2678 = vmatmul.mubr.msk.bf16.gmra.mrb[40].mxu0 %vm1128_vm5, %v1602_v33  ;;  %v1886_v33 = vpop.permute.xlu0 %1885 }
 0x2de   : > { %2681 = vmatprep.mubr.msk.bf16.mxu0 %vm1128_vm5, %v1604_v34  ;;  %v1888_v34 = vpop.permute.xlu1 %1887 }
 0x2e5   : > { %2682 = vmatmul.mubr.msk.bf16.gmra.mrb[44].mxu0 %vm1128_vm5, %v1606_v35  ;;  %v1890_v35 = vpop.permute.xlu0 %1889 }
 0x2e9   : > { %v1894_v37 = vpop.permute.xlu0 %1893 }
 0x380   : > { %v2651_v40 = vpop.f32.mrb[16].mxu0 }
 0x381   : > { %v1497_v41 = vadd.f32 %v2651_v40, %v2391_v39  ;;  %v1488_v42 = vpop.f32.mrb[17].mxu0 }
 0x382   : > { %v1489_v43 = vadd.f32 %v2391_v39, %v1488_v42  ;;  %v2652_v44 = vpop.f32.mrb[18].mxu0 }
 0x383   : > { %v1500_v45 = vadd.f32 %v2652_v44, %v2391_v39  ;;  %v1491_v47 = vpop.f32.mrb[19].mxu0  ;;  %v1553_v51 = vmax.f32 %v1497_v41, 0.0  ;;  %v2431_v41 = vld [vmem:[%s3268_s13] ss:$0 sm:$0xff] }
 0x384   : > { %v1492_v50 = vadd.f32 %v2391_v39, %v1491_v47  ;;  %v1551_v59 = vmax.f32 %v1489_v43, 0.0 }
 0x385   : > { %v1554_v57 = vmax.f32 %v1500_v45, 0.0 }
 0x386   : > { %v1552_v52 = vmax.f32 %v1492_v50, 0.0 }
 0x387   : > { %v1572_v18 = vpack.c.bf16 %v1554_v57, %v1553_v51 }
 0x388   : > { %v1571_v20 = vpack.c.bf16 %v1552_v52, %v1551_v59  ;;  %v2655_v22 = vpop.f32.mrb[20].mxu0 }
 0x389   : > { %v1513_v26 = vadd.f32 %v2655_v22, %v2391_v39  ;;  %v1504_v46 = vpop.f32.mrb[21].mxu0 }
 0x38a   : > { %v1505_v49 = vadd.f32 %v2391_v39, %v1504_v46  ;;  %v2656_v53 = vpop.f32.mrb[22].mxu0  ;;  %2689 = vmatprep.mubr.msk.bf16.mxu0 %vm1128_vm5, %v1571_v20 }
 0x38b   : > { %v1516_v54 = vadd.f32 %v2656_v53, %v2391_v39  ;;  %v1507_v55 = vpop.f32.mrb[23].mxu0  ;;  %2690 = vmatmul.mubr.msk.bf16.vlgmr.msra.gmra.mrb[32].mxu0 %vm1128_vm5, %v1572_v18  ;;  %v1557_v58 = vmax.f32 %v1513_v26, 0.0 }
 0x38c   : > { %v1508_v56 = vadd.f32 %v2391_v39, %v1507_v55  ;;  %2706 = vmatpush3.bf16.msra.mxu0 %v2820_v36  ;;  %v1555_v61 = vmax.f32 %v1505_v49, 0.0  ;;  %v1892_v36 = vpop.permute.xlu1 %1891 }
 0x38d   : > { %v1558_v60 = vmax.f32 %v1516_v54, 0.0  ;;  %2707 = vmatprep.subr.bf16.mxu0 %v2821_v48 }
 0x38e   : > { %v1556_v62 = vmax.f32 %v1508_v56, 0.0 }
 0x38f   : > { %v1574_v63 = vpack.c.bf16 %v1558_v60, %v1557_v58 }
 0x390   : > { %v1573_v0 = vpack.c.bf16 %v1556_v62, %v1555_v61  ;;  %v2659_v1 = vpop.f32.mrb[24].mxu0  ;;  %2708 = vmatpush3.bf16.msra.mxu0 %v2821_v48  ;;  %v1896_v38 = vpop.permute.xlu1 %1895 }
 0x391   : > { %v1529_v2 = vadd.f32 %v2659_v1, %v2391_v39  ;;  %v1520_v3 = vpop.f32.mrb[25].mxu0 }
 0x392   : > { %v1521_v4 = vadd.f32 %v2391_v39, %v1520_v3  ;;  %v2660_v5 = vpop.f32.mrb[26].mxu0  ;;  %2693 = vmatprep.mubr.msk.bf16.mxu0 %vm1128_vm5, %v1573_v0 }
 0x393   : > { %v1532_v6 = vadd.f32 %v2660_v5, %v2391_v39  ;;  %v1523_v7 = vpop.f32.mrb[27].mxu0  ;;  %2694 = vmatmul.mubr.msk.bf16.gmra.mrb[36].mxu0 %vm1128_vm5, %v1574_v63  ;;  %v1561_v9 = vmax.f32 %v1529_v2, 0.0 }
 0x394   : > { %v1524_v8 = vadd.f32 %v2391_v39, %v1523_v7  ;;  %v1559_v11 = vmax.f32 %v1521_v4, 0.0  ;;  %v1900_v40 = vpop.permute.xlu1 %1899 }
 0x395   : > { %v1562_v10 = vmax.f32 %v1532_v6, 0.0 }
 0x396   : > { %v1560_v12 = vmax.f32 %v1524_v8, 0.0 }
 0x397   : > { %v1576_v13 = vpack.c.bf16 %v1562_v10, %v1561_v9 }
 0x398   : > { %v1575_v14 = vpack.c.bf16 %v1560_v12, %v1559_v11  ;;  %v2663_v15 = vpop.f32.mrb[28].mxu0 }
 0x399   : > { %v1545_v16 = vadd.f32 %v2663_v15, %v2391_v39  ;;  %v1536_v17 = vpop.f32.mrb[29].mxu0 }
 0x39a   : > { %v1537_v19 = vadd.f32 %v2391_v39, %v1536_v17  ;;  %v2664_v21 = vpop.f32.mrb[30].mxu0  ;;  %2697 = vmatprep.mubr.msk.bf16.mxu0 %vm1128_vm5, %v1575_v14 }
 0x39b   : > { %v1548_v23 = vadd.f32 %v2664_v21, %v2391_v39  ;;  %v1539_v24 = vpop.f32.mrb[31].mxu0  ;;  %2698 = vmatmul.mubr.msk.bf16.gmra.mrb[40].mxu0 %vm1128_vm5, %v1576_v13  ;;  %v1565_v27 = vmax.f32 %v1545_v16, 0.0 }
 0x39c   : > { %v1540_v25 = vadd.f32 %v2391_v39, %v1539_v24  ;;  %v1563_v29 = vmax.f32 %v1537_v19, 0.0  ;;  %v1898_v39 = vpop.permute.xlu0 %1897 }
 0x39d   : > { %v1566_v28 = vmax.f32 %v1548_v23, 0.0 }
 0x39e   : > { %v1564_v30 = vmax.f32 %v1540_v25, 0.0 }
 0x39f   : > { %v1578_v31 = vpack.c.bf16 %v1566_v28, %v1565_v27 }
 0x3a0   : > { %v1577_v32 = vpack.c.bf16 %v1564_v30, %v1563_v29 }
 0x3a2   : > { %2701 = vmatprep.mubr.msk.bf16.mxu0 %vm1128_vm5, %v1577_v32 }
 0x3a3   : > { %2702 = vmatmul.mubr.msk.bf16.gmra.mrb[44].mxu0 %vm1128_vm5, %v1578_v31 }
 0x3a4   : > { %2709 = vmatprep.mubr.msk.bf16.mxu0 %vm1128_vm5, %v1886_v33 }
 0x3ab   : > { %2710 = vmatmul.mubr.msk.bf16.vlgmr.msra.gmra.mrb[32].mxu0 %vm1128_vm5, %v1888_v34  ;;  %v2432_v34 = vld [vmem:[%s3270_s15] ss:$0 sm:$0xff] }
 0x3ac   : > { %2713 = vmatprep.mubr.msk.bf16.mxu0 %vm1128_vm5, %v1890_v35 }
 0x3b3   : > { %2714 = vmatmul.mubr.msk.bf16.gmra.mrb[36].mxu0 %vm1128_vm5, %v1892_v36 }
 0x3b4   : > { %2717 = vmatprep.mubr.msk.bf16.mxu0 %vm1128_vm5, %v1894_v37 }
 0x3bb   : > { %2718 = vmatmul.mubr.msk.bf16.gmra.mrb[40].mxu0 %vm1128_vm5, %v1896_v38 }
 0x3bc   : > { %2721 = vmatprep.mubr.msk.bf16.mxu0 %vm1128_vm5, %v1898_v39 }
 0x3c3   : > { %2722 = vmatmul.mubr.msk.bf16.gmra.mrb[44].mxu0 %vm1128_vm5, %v1900_v40 }
 0x47e   : > { %v2711_v42 = vpop.f32.mrb[32].mxu0 }
 0x47f   : > { %v2059_v43 = vadd.f32 %v2711_v42, %v2431_v41  ;;  %v1971_v44 = vpop.f32.mrb[33].mxu0 }
 0x480   : > { %v2057_v45 = vadd.f32 %v2431_v41, %v1971_v44  ;;  %v2712_v47 = vpop.f32.mrb[34].mxu0 }
 0x481   : > { %v2060_v50 = vadd.f32 %v2712_v47, %v2431_v41  ;;  %v1974_v51 = vpop.f32.mrb[35].mxu0  ;;  %v2075_v59 = vmax.f32 %v2059_v43, 0.0 }
 0x482   : > { %v2058_v57 = vadd.f32 %v2431_v41, %v1974_v51  ;;  %v2073_v18 = vmax.f32 %v2057_v45, 0.0 }
 0x483   : > { %v2076_v52 = vmax.f32 %v2060_v50, 0.0 }
 0x484   : > { %v2074_v20 = vmax.f32 %v2058_v57, 0.0 }
 0x485   : > { %v2094_v22 = vpack.c.bf16 %v2076_v52, %v2075_v59 }
 0x486   : > { %v2093_v26 = vpack.c.bf16 %v2074_v20, %v2073_v18  ;;  %v2715_v46 = vpop.f32.mrb[36].mxu0 }
 0x487   : > { %v2063_v48 = vadd.f32 %v2715_v46, %v2431_v41  ;;  %v1987_v49 = vpop.f32.mrb[37].mxu0 }
 0x488   : > { %v2061_v53 = vadd.f32 %v2431_v41, %v1987_v49  ;;  %v2716_v54 = vpop.f32.mrb[38].mxu0  ;;  %2729 = vmatprep.mubr.msk.bf16.mxu1 %vm1128_vm5, %v2093_v26 }
 0x489   : > { %v2064_v55 = vadd.f32 %v2716_v54, %v2431_v41  ;;  %v1990_v56 = vpop.f32.mrb[39].mxu0  ;;  %2730 = vmatmul.mubr.msk.bf16.vlgmr.msra.gmra.mrb[48].mxu1 %vm1128_vm5, %v2094_v22  ;;  %v2079_v60 = vmax.f32 %v2063_v48, 0.0 }
 0x48a   : > { %v2062_v58 = vadd.f32 %v2431_v41, %v1990_v56  ;;  %v2077_v62 = vmax.f32 %v2061_v53, 0.0 }
 0x48b   : > { %v2080_v61 = vmax.f32 %v2064_v55, 0.0 }
 0x48c   : > { %v2078_v63 = vmax.f32 %v2062_v58, 0.0 }
 0x48d   : > { %v2096_v0 = vpack.c.bf16 %v2080_v61, %v2079_v60 }
 0x48e   : > { %v2095_v1 = vpack.c.bf16 %v2078_v63, %v2077_v62  ;;  %v2719_v2 = vpop.f32.mrb[40].mxu0 }
 0x48f   : > { %v2067_v3 = vadd.f32 %v2719_v2, %v2431_v41  ;;  %v2003_v4 = vpop.f32.mrb[41].mxu0 }
 0x490   : > { %v2065_v5 = vadd.f32 %v2431_v41, %v2003_v4  ;;  %v2720_v6 = vpop.f32.mrb[42].mxu0  ;;  %2733 = vmatprep.mubr.msk.bf16.mxu1 %vm1128_vm5, %v2095_v1 }
 0x491   : > { %v2068_v7 = vadd.f32 %v2720_v6, %v2431_v41  ;;  %v2006_v8 = vpop.f32.mrb[43].mxu0  ;;  %2734 = vmatmul.mubr.msk.bf16.gmra.mrb[52].mxu1 %vm1128_vm5, %v2096_v0  ;;  %v2083_v10 = vmax.f32 %v2067_v3, 0.0 }
 0x492   : > { %v2066_v9 = vadd.f32 %v2431_v41, %v2006_v8  ;;  %v2081_v12 = vmax.f32 %v2065_v5, 0.0 }
 0x493   : > { %v2084_v11 = vmax.f32 %v2068_v7, 0.0 }
 0x494   : > { %v2082_v13 = vmax.f32 %v2066_v9, 0.0 }
 0x495   : > { %v2098_v14 = vpack.c.bf16 %v2084_v11, %v2083_v10 }
 0x496   : > { %v2097_v15 = vpack.c.bf16 %v2082_v13, %v2081_v12  ;;  %v2723_v16 = vpop.f32.mrb[44].mxu0 }
 0x497   : > { %v2071_v17 = vadd.f32 %v2723_v16, %v2431_v41  ;;  %v2019_v19 = vpop.f32.mrb[45].mxu0 }
 0x498   : > { %v2069_v21 = vadd.f32 %v2431_v41, %v2019_v19  ;;  %v2724_v23 = vpop.f32.mrb[46].mxu0  ;;  %2737 = vmatprep.mubr.msk.bf16.mxu1 %vm1128_vm5, %v2097_v15 }
 0x499   : > { %v2072_v24 = vadd.f32 %v2724_v23, %v2431_v41  ;;  %v2022_v25 = vpop.f32.mrb[47].mxu0  ;;  %2738 = vmatmul.mubr.msk.bf16.gmra.mrb[56].mxu1 %vm1128_vm5, %v2098_v14  ;;  %v2087_v28 = vmax.f32 %v2071_v17, 0.0 }
 0x49a   : > { %v2070_v27 = vadd.f32 %v2431_v41, %v2022_v25  ;;  %v2085_v30 = vmax.f32 %v2069_v21, 0.0 }
 0x49b   : > { %v2088_v29 = vmax.f32 %v2072_v24, 0.0 }
 0x49c   : > { %v2086_v31 = vmax.f32 %v2070_v27, 0.0 }
 0x49d   : > { %v2100_v32 = vpack.c.bf16 %v2088_v29, %v2087_v28 }
 0x49e   : > { %v2099_v33 = vpack.c.bf16 %v2086_v31, %v2085_v30 }
 0x4a0   : > { %2741 = vmatprep.mubr.msk.bf16.mxu1 %vm1128_vm5, %v2099_v33 }
 0x4a1   : > { %2742 = vmatmul.mubr.msk.bf16.gmra.mrb[60].mxu1 %vm1128_vm5, %v2100_v32 }
 0x55c   : > { %v2731_v35 = vpop.f32.mrb[48].mxu1 }
 0x55d   : > { %v2187_v36 = vadd.f32 %v2731_v35, %v2432_v34  ;;  %v2178_v37 = vpop.f32.mrb[49].mxu1 }
 0x55e   : > { %v2179_v38 = vadd.f32 %v2432_v34, %v2178_v37  ;;  %v2732_v39 = vpop.f32.mrb[50].mxu1 }
 0x55f   : > { %2244 = vst.msk [vmem:[%s3218_s24 + $0x10] sm:$0xff] %vm2241_vm7, %v2187_v36  ;;  %v2190_v40 = vadd.f32 %v2732_v39, %v2432_v34  ;;  %v2181_v41 = vpop.f32.mrb[51].mxu1 }
 0x560   : > { %2242 = vst.msk [vmem:[%s3218_s24] sm:$0xff] %vm2241_vm7, %v2179_v38  ;;  %v2182_v42 = vadd.f32 %v2432_v34, %v2181_v41 }
 0x561   : > { %2245 = vst.msk [vmem:[%s3218_s24 + $0x18] sm:$0xff] %vm2241_vm7, %v2190_v40 }
 0x562   : > { %2243 = vst.msk [vmem:[%s3218_s24 + $0x8] sm:$0xff] %vm2241_vm7, %v2182_v42 }
 0x564   : > { %v2735_v43 = vpop.f32.mrb[52].mxu1 }
 0x565   : > { %v2203_v44 = vadd.f32 %v2735_v43, %v2432_v34  ;;  %v2194_v45 = vpop.f32.mrb[53].mxu1 }
 0x566   : > { %v2195_v47 = vadd.f32 %v2432_v34, %v2194_v45  ;;  %v2736_v50 = vpop.f32.mrb[54].mxu1 }
 0x567   : > { %2248 = vst.msk [vmem:[%s3218_s24 + $0x30] sm:$0xff] %vm2241_vm7, %v2203_v44  ;;  %v2206_v51 = vadd.f32 %v2736_v50, %v2432_v34  ;;  %v2197_v57 = vpop.f32.mrb[55].mxu1 }
 0x568   : > { %2246 = vst.msk [vmem:[%s3218_s24 + $0x20] sm:$0xff] %vm2241_vm7, %v2195_v47  ;;  %v2198_v59 = vadd.f32 %v2432_v34, %v2197_v57 }
 0x569   : > { %2249 = vst.msk [vmem:[%s3218_s24 + $0x38] sm:$0xff] %vm2241_vm7, %v2206_v51 }
 0x56a   : > { %2247 = vst.msk [vmem:[%s3218_s24 + $0x28] sm:$0xff] %vm2241_vm7, %v2198_v59 }
 0x56c   : > { %v2739_v52 = vpop.f32.mrb[56].mxu1 }
 0x56d   : > { %v2219_v18 = vadd.f32 %v2739_v52, %v2432_v34  ;;  %v2210_v20 = vpop.f32.mrb[57].mxu1 }
 0x56e   : > { %v2211_v22 = vadd.f32 %v2432_v34, %v2210_v20  ;;  %v2740_v26 = vpop.f32.mrb[58].mxu1 }
 0x56f   : > { %2252 = vst.msk [vmem:[%s3218_s24 + $0x50] sm:$0xff] %vm2241_vm7, %v2219_v18  ;;  %v2222_v46 = vadd.f32 %v2740_v26, %v2432_v34  ;;  %v2213_v48 = vpop.f32.mrb[59].mxu1 }
 0x570   : > { %2250 = vst.msk [vmem:[%s3218_s24 + $0x40] sm:$0xff] %vm2241_vm7, %v2211_v22  ;;  %v2214_v49 = vadd.f32 %v2432_v34, %v2213_v48 }
 0x571   : > { %2253 = vst.msk [vmem:[%s3218_s24 + $0x58] sm:$0xff] %vm2241_vm7, %v2222_v46 }
 0x572   : > { %2251 = vst.msk [vmem:[%s3218_s24 + $0x48] sm:$0xff] %vm2241_vm7, %v2214_v49 }
 0x574   : > { %v2743_v53 = vpop.f32.mrb[60].mxu1 }
 0x575   : > { %v2235_v54 = vadd.f32 %v2743_v53, %v2432_v34  ;;  %v2226_v55 = vpop.f32.mrb[61].mxu1 }
 0x576   : > { %v2227_v56 = vadd.f32 %v2432_v34, %v2226_v55  ;;  %v2744_v58 = vpop.f32.mrb[62].mxu1 }
 0x577   : > { %2256 = vst.msk [vmem:[%s3218_s24 + $0x70] sm:$0xff] %vm2241_vm7, %v2235_v54  ;;  %v2238_v60 = vadd.f32 %v2744_v58, %v2432_v34  ;;  %v2229_v61 = vpop.f32.mrb[63].mxu1 }
 0x578   : > { %2254 = vst.msk [vmem:[%s3218_s24 + $0x60] sm:$0xff] %vm2241_vm7, %v2227_v56  ;;  %v2230_v62 = vadd.f32 %v2432_v34, %v2229_v61 }
 0x579   : > { %2257 = vst.msk [vmem:[%s3218_s24 + $0x78] sm:$0xff] %vm2241_vm7, %v2238_v60 }
 0x57a   : > { %2255 = vst.msk [vmem:[%s3218_s24 + $0x68] sm:$0xff] %vm2241_vm7, %v2230_v62 }
 0x57b PF: > { %s26_s21 = sadd.s32 1, %s2830_s21  }
 0x57c   : > { %p23_p4 = scmp.ge.s32.totalorder %s26_s21, 4  }
 0x57e   :  { %25 = sbr.rel (!%p23_p4) target bundleno = 2 (0x2), region = 117 }

</bundles_post_ra>
